<compile_context>
chip_gen: v7x
topology: tpu7x:2x2x1
jax: 0.10.0
libtpu: 0.0.40
codegen_flags: <defaults>
</compile_context>

<pallas_src>
import functools

import jax
import jax.numpy as jnp
from jax.experimental import pallas as pl
from jax.experimental.pallas import tpu as pltpu


def add_attn_kernel(x_ref, len_ref, w2_ref, bh_ref, wa_ref, ba_ref,
                    v_ref, a_ref, *, precision):
    """One grid step = one block of Bt sequences.

    x_ref  : (Bt, T, D) f32   input sequences
    len_ref: (Bt, 1)    i32   valid lengths per sequence (prefix mask)
    w2_ref : (D, 2H)    f32   [Wx | Wt] fused projection weight
    bh_ref : (1, H) f32, wa_ref: (1, H) f32 (Wa as a row), ba_ref: (1,1) f32 in SMEM
    v_ref  : (Bt, D) f32      attention readout
    a_ref  : (Bt, T) f32      attention weights (lane-dense, T on lanes)
    """
    Bt, T, D = x_ref.shape
    H = w2_ref.shape[1] // 2

    x = x_ref[...]                                    # (Bt, T, D)
    lengths = len_ref[...]                            # (Bt, 1) int32

    # ---- single fused MXU pass: [x@Wx | x@Wt] for the whole block ----
    kq = jnp.dot(x.reshape(Bt * T, D), w2_ref[...],
                 preferred_element_type=jnp.float32,
                 precision=precision).reshape(Bt, T, 2 * H)
    k = kq[:, :, :H]                                  # (Bt, T, H) = x @ Wx
    xt = kq[:, :, H:]                                 # (Bt, T, H) = x @ Wt (per step)

    # ---- get_last_visit folded into H-space: q = onehot(last) . (x @ Wt) ----
    # one-hot built in xt's layout (T on sublanes) -> no lane->sublane relayout.
    # length == 0 falls back to the last row (torch negative-index behavior).
    t_sub = jax.lax.broadcasted_iota(jnp.int32, (Bt, T, 1), 1)
    last_idx = jnp.where(lengths > 0, lengths - 1, T - 1)            # (Bt, 1)
    onehot = (t_sub == last_idx[:, :, None]).astype(jnp.float32)     # (Bt, T, 1)
    q = jnp.sum(onehot * xt, axis=1)                                  # (Bt, H)

    h = jnp.tanh(k + q[:, None, :] + bh_ref[...])                     # (Bt, T, H)

    # ---- e = h @ Wa + ba as VPU multiply + lane reduce (Wa has N == 1) ----
    e = jnp.sum(h * wa_ref[...], axis=-1) + ba_ref[0, 0]              # (Bt, T)

    # ---- mask padded steps, softmax over time (lane axis) ----
    t_lane = jax.lax.broadcasted_iota(jnp.int32, (Bt, T), 1)
    e = jnp.where(t_lane < lengths, e, jnp.float32(-1e9))
    e = e - jnp.max(e, axis=-1, keepdims=True)
    p = jnp.exp(e)
    a = p * pl.reciprocal(jnp.sum(p, axis=-1, keepdims=True), approx=False)
    a_ref[...] = a                                                    # lane-dense store

    # ---- v = sum_t a[:, t] * x[:, t, :] ----
    v_ref[...] = jnp.sum(a[:, :, None] * x, axis=1)                   # (Bt, D)


def _round_up(x, m):
    return ((x + m - 1) // m) * m


def _choose_block_b(B, T, D, H, *, vmem_budget_bytes=24 << 20, max_block=4096):
    """Pick the batch block size Bt (multiple of 8).

    Big blocks amortize the ~0.35 us per-grid-step pipeline overhead (important
    when T*D is small), but stay under a per-step VMEM budget (important at
    production T/D on v7x's 64 MiB VMEM), and aim for >= 2 grid steps once
    B >= 16 so the 'parallel' axis splits across v7x's two TensorCores.
    """
    # Rough per-sequence f32 footprint of one step: double-buffered (T,D) input
    # slab + (T,2H) fused projection + (T,H) h + (T,D) readout broadcast temp.
    per_seq = 4 * T * (3 * D + 3 * H)
    cap = max(8, min(max_block, (vmem_budget_bytes // max(per_seq, 1)) // 8 * 8))
    want = max(8, _round_up(pl.cdiv(B, 2), 8))      # ~half the batch per step
    return min(cap, want)


def single_attention_add(x, mask, Wt, Wx, bh, Wa, ba, *, block_b=None,
                         precision=jax.lax.Precision.DEFAULT):
    """'add'-type SingleAttention forward.

    x: (B, T, D) f32, mask: (B, T) {0,1} contiguous-prefix mask (pyhealth style).
    Returns (v: (B, D), a: (B, T)).
    """
    B, T, D = x.shape
    H = Wt.shape[1]

    # int32 sequence lengths replace the (B, T, 1) float mask stream.
    # NOTE: assumes the mask is a contiguous prefix of 1s (as produced by
    # pyhealth); interior zeros would diverge from masked_fill semantics.
    lengths = jnp.sum(mask.astype(jnp.int32), axis=1).reshape(B, 1)

    # Fuse Wx and Wt so the kernel runs one (Bt*T, D) @ (D, 2H) MXU pass.
    W2 = jnp.concatenate([Wx, Wt], axis=1)                            # (D, 2H)

    if block_b is None:
        Bt = _choose_block_b(B, T, D, H)
    else:
        Bt = max(8, (block_b // 8) * 8)

    n_blocks = pl.cdiv(B, Bt)
    Bp = n_blocks * Bt
    if Bp != B:
        x = jnp.pad(x, ((0, Bp - B), (0, 0), (0, 0)))
        lengths = jnp.pad(lengths, ((0, Bp - B), (0, 0)), constant_values=1)

    kernel = functools.partial(add_attn_kernel, precision=precision)

    v, a = pl.pallas_call(
        kernel,
        out_shape=(jax.ShapeDtypeStruct((Bp, D), jnp.float32),
                   jax.ShapeDtypeStruct((Bp, T), jnp.float32)),
        grid=(n_blocks,),
        in_specs=[
            pl.BlockSpec((Bt, T, D), lambda b: (b, 0, 0)),            # x block
            pl.BlockSpec((Bt, 1), lambda b: (b, 0)),                  # lengths block
            pl.BlockSpec((D, 2 * H), lambda b: (0, 0)),               # [Wx | Wt]
            pl.BlockSpec((1, H), lambda b: (0, 0)),                   # bh (row)
            pl.BlockSpec((1, H), lambda b: (0, 0)),                   # Wa (as a row)
            pl.BlockSpec(memory_space=pltpu.MemorySpace.SMEM),        # ba scalar
        ],
        out_specs=(pl.BlockSpec((Bt, D), lambda b: (b, 0)),
                   pl.BlockSpec((Bt, T), lambda b: (b, 0))),
        compiler_params=pltpu.CompilerParams(
            dimension_semantics=("parallel",),
            vmem_limit_bytes=48 * 1024 * 1024),
    )(x, lengths, W2, bh.reshape(1, H), Wa.reshape(1, H), ba.reshape(1, 1))

    # TODO(synk): if T/D are not multiples of 128 in production, padding the
    # outputs to lane-dense widths would turn the (small) v/a stores into
    # unmasked vst; skipped here because it would also inflate the x DMA.
    return v[:B], a[:B]


def reference_add(x, mask, Wt, Wx, bh, Wa, ba):
    """Pure-JAX reference mirroring the PyTorch 'add' forward (f32 HIGHEST)."""
    hp = jax.lax.Precision.HIGHEST
    B, T, D = x.shape
    last_idx = jnp.sum(mask, axis=1).astype(jnp.int32) - 1
    last_visit = x[jnp.arange(B), last_idx, :]                            # (B, D)
    q = jnp.dot(last_visit, Wt, precision=hp)                             # (B, H)
    k = jnp.einsum('btd,dh->bth', x, Wx, precision=hp)                    # (B, T, H)
    h = jnp.tanh(q[:, None, :] + k + bh)
    e = jnp.einsum('bth,h->bt', h, Wa[:, 0], precision=hp) + ba[0]
    e = jnp.where(mask == 0, -1e9, e)
    a = jax.nn.softmax(e, axis=1)
    v = jnp.einsum('bt,btd->bd', a, x, precision=hp)
    return v, a


def init_params(key, input_dim, hidden_dim):
    """Deterministic kaiming-uniform(a=sqrt(5))-style init for the 'add' params."""
    k1, k2, k3 = jax.random.split(key, 3)

    def ku(k, shape):
        bound = 1.0 / jnp.sqrt(jnp.float32(shape[1]))
        return jax.random.uniform(k, shape, jnp.float32, -bound, bound)

    Wt = ku(k1, (input_dim, hidden_dim))
    Wx = ku(k2, (input_dim, hidden_dim))
    Wa = ku(k3, (hidden_dim, 1))
    bh = jnp.zeros((hidden_dim,), jnp.float32)
    ba = jnp.zeros((1,), jnp.float32)
    return Wt, Wx, bh, Wa, ba


if __name__ == "__main__":
    B, T, D, H = 2, 8, 32, 32  # batch, time_step, attention_input_dim, attention_hidden_dim

    key = jax.random.PRNGKey(0)
    kx, kp = jax.random.split(key)
    x = jax.random.normal(kx, (B, T, D), jnp.float32)

    # Deterministic prefix mask: sequence lengths [8, 5]
    lens = jnp.array([8, 5], jnp.int32)
    mask = (jnp.arange(T)[None, :] < lens[:, None]).astype(jnp.float32)   # (B, T)

    Wt, Wx, bh, Wa, ba = init_params(kp, D, H)

    v_ref, a_ref = reference_add(x, mask, Wt, Wx, bh, Wa, ba)

    # Fast path (DEFAULT matmul precision -- the performance configuration).
    v, a = single_attention_add(x, mask, Wt, Wx, bh, Wa, ba)
    v = jax.block_until_ready(v)
    a = jax.block_until_ready(a)
    assert v.shape == (B, D) and a.shape == (B, T)
    assert jnp.allclose(v, v_ref, atol=3e-2, rtol=3e-2), "v mismatch (fast path)"
    assert jnp.allclose(a, a_ref, atol=3e-2, rtol=3e-2), "a mismatch (fast path)"

    # Exact path (HIGHEST precision) against the f32 reference at tight tolerance.
    v_hi, a_hi = single_attention_add(x, mask, Wt, Wx, bh, Wa, ba,
                                      precision=jax.lax.Precision.HIGHEST)
    v_hi = jax.block_until_ready(v_hi)
    a_hi = jax.block_until_ready(a_hi)
    assert jnp.allclose(v_hi, v_ref, atol=1e-4, rtol=1e-4), "v mismatch (HIGHEST)"
    assert jnp.allclose(a_hi, a_ref, atol=1e-4, rtol=1e-4), "a mismatch (HIGHEST)"

    print("KERNEL_OK")
</pallas_src>

<mosaic_0001>
module attributes {stable_mosaic.version = 11 : i64} {
  func.func @add_attn_kernel(%arg0: i32, %arg1: memref<8x8x32xf32, #tpu.memory_space<vmem>>, %arg2: memref<8x1xi32, #tpu.memory_space<vmem>>, %arg3: memref<32x64xf32, #tpu.memory_space<vmem>>, %arg4: memref<1x32xf32, #tpu.memory_space<vmem>>, %arg5: memref<1x32xf32, #tpu.memory_space<vmem>>, %arg6: memref<1x1xf32, #tpu.memory_space<smem>>, %arg7: memref<8x32xf32, #tpu.memory_space<vmem>>, %arg8: memref<8x8xf32, #tpu.memory_space<vmem>>) attributes {dimension_semantics = [#tpu.dimension_semantics<parallel>], iteration_bounds = array<i64: 1>, scalar_prefetch = 0 : i64, scratch_operands = 0 : i64, tpu.core_type = #tpu.core_type<tc>, window_params = [{transform_indices = @transform_0, window_bounds = array<i64: 8, 8, 32>}, {transform_indices = @transform_1, window_bounds = array<i64: 8, 1>}, {pipeline_mode = #tpu.pipeline_mode<synchronous>, transform_indices = @transform_2, window_bounds = array<i64: 32, 64>}, {pipeline_mode = #tpu.pipeline_mode<synchronous>, transform_indices = @transform_3, window_bounds = array<i64: 1, 32>}, {pipeline_mode = #tpu.pipeline_mode<synchronous>, transform_indices = @transform_4, window_bounds = array<i64: 1, 32>}, {transform_indices = @transform_5, window_bounds = array<i64: 1, 1>}, {transform_indices = @transform_6, window_bounds = array<i64: 8, 32>}, {transform_indices = @transform_7, window_bounds = array<i64: 8, 8>}]} {
    %c0 = arith.constant 0 : index
    %c0_0 = arith.constant 0 : index
    %c0_1 = arith.constant 0 : index
    %0 = vector.load %arg1[%c0, %c0_0, %c0_1] : memref<8x8x32xf32, #tpu.memory_space<vmem>>, vector<8x8x32xf32>
    %c0_2 = arith.constant 0 : index
    %c0_3 = arith.constant 0 : index
    %1 = vector.load %arg2[%c0_2, %c0_3] : memref<8x1xi32, #tpu.memory_space<vmem>>, vector<8x1xi32>
    %2 = vector.shape_cast %0 : vector<8x8x32xf32> to vector<64x32xf32>
    %c0_4 = arith.constant 0 : index
    %c0_5 = arith.constant 0 : index
    %3 = vector.load %arg3[%c0_4, %c0_5] : memref<32x64xf32, #tpu.memory_space<vmem>>, vector<32x64xf32>
    %cst = arith.constant dense<0.000000e+00> : vector<64x64xf32>
    %4 = tpu.matmul %2, %3, %cst {dimension_numbers = #tpu.dot_dimension_numbers<[1], [0], [0], [1], [0, 0, 1, 1], [], []>} : vector<64x32xf32>, vector<32x64xf32>, vector<64x64xf32> -> vector<64x64xf32>
    %5 = vector.shape_cast %4 : vector<64x64xf32> to vector<8x8x64xf32>
    %6 = vector.extract_strided_slice %5 {offsets = [0, 0, 0], sizes = [8, 8, 32], strides = [1, 1, 1]} : vector<8x8x64xf32> to vector<8x8x32xf32>
    %7 = vector.extract_strided_slice %5 {offsets = [0, 0, 32], sizes = [8, 8, 32], strides = [1, 1, 1]} : vector<8x8x64xf32> to vector<8x8x32xf32>
    %8 = tpu.iota {dimensions = array<i32: 1>} : vector<8x8x1xi32>
    %c0_i32 = arith.constant 0 : i32
    %9 = vector.broadcast %c0_i32 : i32 to vector<8x1xi32>
    %10 = arith.cmpi sgt, %1, %9 : vector<8x1xi32>
    %c1_i32 = arith.constant 1 : i32
    %11 = vector.broadcast %c1_i32 : i32 to vector<8x1xi32>
    %12 = arith.subi %1, %11 : vector<8x1xi32>
    %c7_i32 = arith.constant 7 : i32
    %13 = vector.broadcast %c7_i32 : i32 to vector<8x1xi32>
    %14 = arith.select %10, %12, %13 : vector<8x1xi1>, vector<8x1xi32>
    %15 = vector.shape_cast %14 : vector<8x1xi32> to vector<8x1x1xi32>
    %16 = vector.broadcast %15 : vector<8x1x1xi32> to vector<8x8x1xi32>
    %17 = arith.cmpi eq, %8, %16 : vector<8x8x1xi32>
    %18 = arith.extui %17 : vector<8x8x1xi1> to vector<8x8x1xi32>
    %19 = arith.sitofp %18 : vector<8x8x1xi32> to vector<8x8x1xf32>
    %20 = vector.broadcast %19 : vector<8x8x1xf32> to vector<8x8x32xf32>
    %21 = arith.mulf %20, %7 : vector<8x8x32xf32>
    %cst_6 = arith.constant dense<0.000000e+00> : vector<8x32xf32>
    %22 = vector.multi_reduction <add>, %21, %cst_6 [1] : vector<8x8x32xf32> to vector<8x32xf32>
    %23 = vector.shape_cast %22 : vector<8x32xf32> to vector<8x1x32xf32>
    %24 = vector.broadcast %23 : vector<8x1x32xf32> to vector<8x8x32xf32>
    %25 = arith.addf %6, %24 : vector<8x8x32xf32>
    %c0_7 = arith.constant 0 : index
    %c0_8 = arith.constant 0 : index
    %26 = vector.load %arg4[%c0_7, %c0_8] : memref<1x32xf32, #tpu.memory_space<vmem>>, vector<1x32xf32>
    %27 = vector.shape_cast %26 : vector<1x32xf32> to vector<1x1x32xf32>
    %28 = vector.broadcast %27 : vector<1x1x32xf32> to vector<8x8x32xf32>
    %29 = arith.addf %25, %28 : vector<8x8x32xf32>
    %30 = math.tanh %29 : vector<8x8x32xf32>
    %c0_9 = arith.constant 0 : index
    %c0_10 = arith.constant 0 : index
    %31 = vector.load %arg5[%c0_9, %c0_10] : memref<1x32xf32, #tpu.memory_space<vmem>>, vector<1x32xf32>
    %32 = vector.shape_cast %31 : vector<1x32xf32> to vector<1x1x32xf32>
    %33 = vector.broadcast %32 : vector<1x1x32xf32> to vector<8x8x32xf32>
    %34 = arith.mulf %30, %33 : vector<8x8x32xf32>
    %cst_11 = arith.constant dense<0.000000e+00> : vector<8x8xf32>
    %35 = vector.multi_reduction <add>, %34, %cst_11 [2] : vector<8x8x32xf32> to vector<8x8xf32>
    %c0_12 = arith.constant 0 : index
    %c0_13 = arith.constant 0 : index
    %36 = memref.load %arg6[%c0_12, %c0_13] : memref<1x1xf32, #tpu.memory_space<smem>>
    %37 = vector.broadcast %36 : f32 to vector<8x8xf32>
    %38 = arith.addf %35, %37 : vector<8x8xf32>
    %39 = tpu.iota {dimensions = array<i32: 1>} : vector<8x8xi32>
    %40 = vector.broadcast %1 : vector<8x1xi32> to vector<8x8xi32>
    %41 = arith.cmpi slt, %39, %40 : vector<8x8xi32>
    %cst_14 = arith.constant -1.000000e+09 : f32
    %42 = vector.broadcast %cst_14 : f32 to vector<8x8xf32>
    %43 = arith.select %41, %38, %42 : vector<8x8xi1>, vector<8x8xf32>
    %cst_15 = arith.constant dense<0xFF800000> : vector<8xf32>
    %44 = vector.multi_reduction <maximumf>, %43, %cst_15 [1] : vector<8x8xf32> to vector<8xf32>
    %45 = vector.shape_cast %44 : vector<8xf32> to vector<8x1xf32>
    %46 = vector.broadcast %45 : vector<8x1xf32> to vector<8x8xf32>
    %47 = arith.subf %43, %46 : vector<8x8xf32>
    %48 = math.exp %47 : vector<8x8xf32>
    %cst_16 = arith.constant dense<0.000000e+00> : vector<8xf32>
    %49 = vector.multi_reduction <add>, %48, %cst_16 [1] : vector<8x8xf32> to vector<8xf32>
    %50 = vector.shape_cast %49 : vector<8xf32> to vector<8x1xf32>
    %51 = tpu.reciprocal %50 : vector<8x1xf32> -> vector<8x1xf32>
    %52 = vector.broadcast %51 : vector<8x1xf32> to vector<8x8xf32>
    %53 = arith.mulf %48, %52 : vector<8x8xf32>
    %c0_17 = arith.constant 0 : index
    %c0_18 = arith.constant 0 : index
    %54 = vector.load %arg8[%c0_17, %c0_18] : memref<8x8xf32, #tpu.memory_space<vmem>>, vector<8x8xf32>
    tpu.vector_store %arg8[%c0_17, %c0_18], %53 {strides = array<i32>} : memref<8x8xf32, #tpu.memory_space<vmem>>, vector<8x8xf32>,
    %55 = vector.shape_cast %53 : vector<8x8xf32> to vector<8x8x1xf32>
    %56 = vector.broadcast %55 : vector<8x8x1xf32> to vector<8x8x32xf32>
    %57 = arith.mulf %56, %0 : vector<8x8x32xf32>
    %cst_19 = arith.constant dense<0.000000e+00> : vector<8x32xf32>
    %58 = vector.multi_reduction <add>, %57, %cst_19 [1] : vector<8x8x32xf32> to vector<8x32xf32>
    %c0_20 = arith.constant 0 : index
    %c0_21 = arith.constant 0 : index
    %59 = vector.load %arg7[%c0_20, %c0_21] : memref<8x32xf32, #tpu.memory_space<vmem>>, vector<8x32xf32>
    tpu.vector_store %arg7[%c0_20, %c0_21], %58 {strides = array<i32>} : memref<8x32xf32, #tpu.memory_space<vmem>>, vector<8x32xf32>,
    return
  }
  func.func @transform_0(%arg0: i32) -> (i32, i32, i32) {
    %c0_i32 = arith.constant 0 : i32
    %c0_i32_0 = arith.constant 0 : i32
    %c0_i32_1 = arith.constant 0 : i32
    return %arg0, %c0_i32, %c0_i32_0 : i32, i32, i32
  }
  func.func @transform_1(%arg0: i32) -> (i32, i32) {
    %c0_i32 = arith.constant 0 : i32
    %c0_i32_0 = arith.constant 0 : i32
    return %arg0, %c0_i32 : i32, i32
  }
  func.func @transform_2(%arg0: i32) -> (i32, i32) {
    %c0_i32 = arith.constant 0 : i32
    %c0_i32_0 = arith.constant 0 : i32
    %c0_i32_1 = arith.constant 0 : i32
    return %c0_i32, %c0_i32_0 : i32, i32
  }
  func.func @transform_3(%arg0: i32) -> (i32, i32) {
    %c0_i32 = arith.constant 0 : i32
    %c0_i32_0 = arith.constant 0 : i32
    %c0_i32_1 = arith.constant 0 : i32
    return %c0_i32, %c0_i32_0 : i32, i32
  }
  func.func @transform_4(%arg0: i32) -> (i32, i32) {
    %c0_i32 = arith.constant 0 : i32
    %c0_i32_0 = arith.constant 0 : i32
    %c0_i32_1 = arith.constant 0 : i32
    return %c0_i32, %c0_i32_0 : i32, i32
  }
  func.func @transform_5(%arg0: i32) -> (i32, i32) {
    %c0_i32 = arith.constant 0 : i32
    %c0_i32_0 = arith.constant 0 : i32
    %c0_i32_1 = arith.constant 0 : i32
    return %c0_i32, %c0_i32_0 : i32, i32
  }
  func.func @transform_6(%arg0: i32) -> (i32, i32) {
    %c0_i32 = arith.constant 0 : i32
    %c0_i32_0 = arith.constant 0 : i32
    return %arg0, %c0_i32 : i32, i32
  }
  func.func @transform_7(%arg0: i32) -> (i32, i32) {
    %c0_i32 = arith.constant 0 : i32
    %c0_i32_0 = arith.constant 0 : i32
    return %arg0, %c0_i32 : i32, i32
  }
}

</mosaic_0001>

<bundles_post_ra>
// kernel: tpu_custom_call.1
= control target key start
LH: loop header
LB: loop body
LE: loop exit
PB: predicated region body
PF: predicated region fallthrough
CT: control target
= control target key end

     0   :  { %14 = vsyncpa [#allocation4], 0  ;;  %s1241_s0 = inlined_call_operand.hbm [shape: f32[8,8,32], index: 0, kind: input, shape index: {}]   ;;  %s1242_s1 = inlined_call_operand.vmem [shape: s32[8,1], index: 1, kind: input, shape index: {}]   ;;  %s1243_s2 = inlined_call_operand.hbm [shape: f32[32,64], index: 2, kind: input, shape index: {}]   ;;  %s1244_s3 = inlined_call_operand.vmem [shape: f32[1,32], index: 3, kind: input, shape index: {}]   ;;  %s1245_s4 = inlined_call_operand.vmem [shape: f32[1,32], index: 4, kind: input, shape index: {}]   ;;  %s1246_s5 = inlined_call_operand.<no memory space> [shape: f32[1,1], index: 5, kind: input, shape index: {}]   ;;  %s1247_s6 = inlined_call_operand.hbm [shape: f32[8,32], index: 6, kind: output, shape index: {0}]   ;;  %s1248_s7 = inlined_call_operand.hbm [shape: f32[8,8], index: 7, kind: output, shape index: {1}]  }
   0x1   :  { %15 = vsyncpa [#allocation7], 0 }
   0x2   :  { %16 = vsyncpa [#allocation5], 0 }
   0x3   :  { %17 = vsyncpa [#allocation10], 0  ;;  %s979_s24 = smov [#allocation3]   ;;  %s883_s28 = scalar_lea.hbm %s1241_s0, 1024 }
   0x4   :  { %s23_s25 = sshll.u32 %s979_s24, 4  ;;  %p884_p0 = scmp.ne.s32.totalorder %s1241_s0, %s883_s28  ;;  %s24_s25 = int_to_ptr.vmem [resolvable:$true] %s23_s25 }
   0x5   :  { %p887_p1 = scmp.lt.u32.totalorder %s883_s28, %s1241_s0 }
   0x7   :  { %p889_p2 = pnand %p887_p1, %p884_p0 }
   0x9   :  { %892 = shalt.err (!%p889_p2)
}
   0xa   :  { %s893_s10 = scalar_lea.vmem %s24_s25, 1024  ;;  %p898_p4 = scmp.lt.s32.totalorder %s24_s25, %s24_s25 }
   0xb   :  { %p894_p3 = scmp.ne.s32.totalorder %s24_s25, %s893_s10  ;;  %p899_p5 = scmp.lt.s32.totalorder %s893_s10, %s893_s10 }
   0xd   :  { %p900_p6 = por %p899_p5, %p898_p4 }
   0xf   :  { %p901_p7 = pnand %p900_p6, %p894_p3 }
  0x11   :  { %904 = shalt.err (!%p901_p7)
}
  0x12   :  { %s980_s11 = smov 128   ;;  %s981_s12 = smov 8  }
  0x13   :  { %29 = dma.hbm_to_vmem [thread:$0]  %s1241_s0, 1024, %s24_s25, [#allocation4], %s980_s11, %s980_s11, %s981_s12  }
  0x14   :  { %s982_s15 = smov [#allocation6]   ;;  %s905_s19 = scalar_lea.hbm %s1243_s2, 512 }
  0x15   :  { %s37_s16 = sshll.u32 %s982_s15, 4  ;;  %p906_p8 = scmp.ne.s32.totalorder %s1243_s2, %s905_s19  ;;  %s38_s16 = int_to_ptr.vmem [resolvable:$true] %s37_s16 }
  0x16   :  { %p909_p9 = scmp.lt.u32.totalorder %s905_s19, %s1243_s2 }
  0x18   :  { %p911_p10 = pnand %p909_p9, %p906_p8 }
  0x1a   :  { %914 = shalt.err (!%p911_p10)
}
  0x1b   :  { %s915_s24 = scalar_lea.vmem %s38_s16, 512  ;;  %p920_p12 = scmp.lt.s32.totalorder %s38_s16, %s38_s16 }
  0x1c   :  { %p916_p11 = scmp.ne.s32.totalorder %s38_s16, %s915_s24  ;;  %p921_p13 = scmp.lt.s32.totalorder %s915_s24, %s915_s24 }
  0x1e   :  { %p922_p0 = por %p921_p13, %p920_p12 }
  0x20   :  { %p923_p1 = pnand %p922_p0, %p916_p11 }
  0x22   :  { %926 = shalt.err (!%p923_p1)
}
  0x23   :  { %43 = dma.hbm_to_vmem [thread:$0]  %s1243_s2, 512, %s38_s16, [#allocation7], %s980_s11, %s980_s11, %s981_s12  }
  0x24   :  { %971 = dma.done.wait [#allocation4], 1024  }
  0x25   :  { %972 = vsyncadd [#allocation4], 4294966272 }
  0x26   :  { %973 = dma.done.wait [#allocation7], 512  }
  0x27   :  { %974 = vsyncadd [#allocation7], 4294966784  ;;  %v983_v0 = vmov 0   ;;  %v199_v1 = vlaneseq  ;;  %v984_v2 = vmov 1966171168   ;;  %vm69_vm0 = vcmask 261120  }
  0x28   :  { %841 = vset.pattern.permute.xlu0 %v983_v0  ;;  %852 = vset.pattern.permute.xlu1 %v983_v0  ;;  %v206_v3 = vunpack.c.l.s4 %v984_v2  ;;  %v65_v4 = vld [vmem:[#allocation6] sm:$0xff]  ;;  %v66_v5 = vld [vmem:[#allocation6 + $0x8] sm:$0xff]  ;;  %v67_v6 = vld [vmem:[#allocation6 + $0x10] sm:$0xff]  ;;  %v985_v38 = vmov 0.0   ;;  %vm357_vm10 = vcmask 523520   ;;  %vm572_vm11 = vcmask 1041409  }
  0x29   :  { %v1054_v7 = vshrl.u32 %v199_v1, 7  ;;  %v819_v9 = vpack.c.bf16 %v66_v5, %v65_v4  ;;  %v68_v10 = vld [vmem:[#allocation6 + $0x18] sm:$0xff]  ;;  %v1056_v11 = vld [vmem:[#allocation3] sm:$0xff]  ;;  %v1072_v18 = vld [vmem:[#allocation3 + $0x8] sm:$0xff]  ;;  %vm574_vm12 = vcmask 1042434   ;;  %vm576_vm13 = vcmask 1043459  }
  0x2a   :  { %v207_v8 = vunpack.c.0.s8 %v206_v3  ;;  %v1058_v12 = vld [vmem:[#allocation3 + $0x20] sm:$0xff]  ;;  %v823_v13 = vpack.c.bf16 %v68_v10, %v67_v6  ;;  %807 = vmatprep.mubr.msk.f32.mxu0 %vm69_vm0, %v1056_v11  ;;  %v1074_v19 = vld [vmem:[#allocation3 + $0x28] sm:$0xff]  ;;  %v1079_v23 = vld [vmem:[#allocation3 + $0x10] sm:$0xff]  ;;  %vm578_vm14 = vcmask 1044484   ;;  %vm580_vm15 = vcmask 1045509  }
  0x2b   :  { %813 = vmatprep.mubr.msk.f32.mxu1 %vm69_vm0, %v1058_v12  ;;  %820 = vmatprep.subr.bf16.mxu0 %v819_v9  ;;  %v1067_v14 = vld [vmem:[%s1242_s1] sm:$0xff]  ;;  %v1077_v21 = vsub.s32 0, %v1054_v7  ;;  %v1081_v24 = vld [vmem:[#allocation3 + $0x30] sm:$0xff]  ;;  %v1091_v28 = vld [vmem:[#allocation3 + $0x18] sm:$0xff]  ;;  %s986_s1 = smov 96  }
  0x2c   :  { %827 = vmatprep.subr.bf16.mxu1 %v819_v9  ;;  %822 = vmatpush3.bf16.msra.mxu0 %v819_v9  ;;  %v210_v15 = vsub.s32 %v207_v8, %v1054_v7  ;;  %vm201_vm1 = vcmp.gt.s32.totalorder %v1067_v14, 0  ;;  %v776_v16 = vadd.s32 4294967295, %v1067_v14  ;;  %v1093_v29 = vld [vmem:[#allocation3 + $0x38] sm:$0xff] }
  0x2d   :  { %829 = vmatpush3.bf16.msra.mxu1 %v819_v9  ;;  %824 = vmatprep.subr.bf16.mxu0 %v823_v13 }
  0x2e   :  { %828 = vmatprep.subr.bf16.mxu1 %v823_v13  ;;  %v203_v17 = vsel %vm201_vm1, %v776_v16, 7  ;;  %vm582_vm1 = vcmask 1046534  }
  0x2f   :  { %v211_v20 = vrot.slane %v203_v17, %v210_v15  ;;  %v204_v22 = vcombine.high %v203_v17, %v203_v17 }
  0x30   :  { %826 = vmatpush3.bf16.msra.mxu0 %v823_v13 }
  0x31   :  { %830 = vmatpush3.bf16.msra.mxu1 %v823_v13  ;;  %v219_v25 = vcombine.high %v211_v20, %v211_v20  ;;  %v227_v26 = vrot.slane %v211_v20, %v210_v15  ;;  %v218_v27 = vrot.slane %v204_v22, %v210_v15 }
  0x33   :  { %808 = vmatmul.mubr.msk.f32.vlgmr.msra.gmra.mrb[0].mxu0 %vm69_vm0, %v1072_v18  ;;  %v241_v30 = vrot.slane %v219_v25, %v210_v15  ;;  %v249_v31 = vcombine.high %v227_v26, %v227_v26  ;;  %v256_v32 = vrot.slane %v227_v26, %v1077_v21  ;;  %v220_v33 = vcombine.high %v218_v27, %v218_v27 }
  0x34   :  { %814 = vmatmul.mubr.msk.f32.vlgmr.msra.gmra.mrb[0].mxu1 %vm69_vm0, %v1074_v19  ;;  %810 = vmatprep.mubr.msk.f32.mxu0 %vm69_vm0, %v1079_v23  ;;  %v234_v34 = vrot.slane %v218_v27, %v210_v15 }
  0x35   :  { %816 = vmatprep.mubr.msk.f32.mxu1 %vm69_vm0, %v1081_v24  ;;  %v260_v35 = vrot.slane %v241_v30, %v1077_v21  ;;  %vm285_vm2 = vcmp.eq.s32.totalorder %v1054_v7, %v256_v32  ;;  %v251_v36 = vcombine.high %v241_v30, %v241_v30  ;;  %v264_v37 = vrot.slane %v249_v31, %v1077_v21 }
  0x36   :  { %v777_v39 = vsel %vm285_vm2, 1.0, %v985_v38  ;;  %v248_v40 = vrot.slane %v220_v33, %v210_v15  ;;  %v250_v41 = vcombine.high %v234_v34, %v234_v34  ;;  %v272_v42 = vrot.slane %v234_v34, %v1077_v21 }
  0x37   :  { %811 = vmatmul.mubr.msk.f32.gmra.mrb[2].mxu0 %vm69_vm0, %v1091_v28  ;;  %vm286_vm3 = vcmp.eq.s32.totalorder %v1054_v7, %v260_v35  ;;  %v268_v43 = vrot.slane %v251_v36, %v1077_v21  ;;  %vm287_vm4 = vcmp.eq.s32.totalorder %v1054_v7, %v264_v37  ;;  %vm584_vm2 = vcmask 1047559  }
  0x38   :  { %817 = vmatmul.mubr.msk.f32.gmra.mrb[2].mxu1 %vm69_vm0, %v1093_v29  ;;  %v778_v44 = vsel %vm286_vm3, 1.0, %v985_v38  ;;  %v779_v45 = vsel %vm287_vm4, 1.0, %v985_v38  ;;  %v276_v46 = vrot.slane %v248_v40, %v1077_v21  ;;  %vm289_vm5 = vcmp.eq.s32.totalorder %v1054_v7, %v272_v42 }
  0x39   :  { %v842_v47 = vpack.i.bf16 %v778_v44, %v777_v39  ;;  %vm288_vm6 = vcmp.eq.s32.totalorder %v1054_v7, %v268_v43  ;;  %v781_v48 = vsel %vm289_vm5, 1.0, %v985_v38  ;;  %v252_v49 = vcombine.high %v248_v40, %v248_v40 }
  0x3a   :  { %v780_v50 = vsel %vm288_vm6, 1.0, %v985_v38  ;;  %vm290_vm7 = vcmp.eq.s32.totalorder %v1054_v7, %v276_v46  ;;  %v280_v51 = vrot.slane %v250_v41, %v1077_v21  ;;  %vm588_vm3 = vcmask 64512  }
  0x3b   :  { %843 = vperm.xlu0 %841, %v842_v47   ;;  %v847_v52 = vpack.i.bf16 %v780_v50, %v779_v45  ;;  %v782_v53 = vsel %vm290_vm7, 1.0, %v985_v38  ;;  %v284_v54 = vrot.slane %v252_v49, %v1077_v21 }
  0x3c   :  { %v853_v55 = vpack.i.bf16 %v782_v53, %v781_v48  ;;  %vm291_vm8 = vcmp.eq.s32.totalorder %v1054_v7, %v280_v51 }
  0x3d   :  { %vm292_vm9 = vcmp.eq.s32.totalorder %v1054_v7, %v284_v54  ;;  %v783_v56 = vsel %vm291_vm8, 1.0, %v985_v38 }
  0x3e   :  { %854 = vperm.xlu1 %852, %v853_v55   ;;  %v784_v57 = vsel %vm292_vm9, 1.0, %v985_v38 }
  0x3f   :  { %848 = vperm.xlu0 %841, %v847_v52   ;;  %v858_v58 = vpack.i.bf16 %v784_v57, %v783_v56 }
  0x42   :  { %859 = vperm.xlu1 %852, %v858_v58  }
  0xba   :  { %v844_v60 = vpop.permute.xlu0 %843 }
  0xbb   :  { %v846_v61 = vunpack.i.h.bf16 %v844_v60  ;;  %v845_v63 = vunpack.i.l.bf16 %v844_v60 }
  0xbd   :  { %v855_v59 = vpop.permute.xlu1 %854 }
  0xbe   :  { %v857_v62 = vunpack.i.h.bf16 %v855_v59  ;;  %v856_v0 = vunpack.i.l.bf16 %v855_v59  ;;  %v849_v3 = vpop.permute.xlu0 %848 }
  0xbf   :  { %v851_v20 = vunpack.i.h.bf16 %v849_v3  ;;  %v850_v22 = vunpack.i.l.bf16 %v849_v3 }
  0xc1   :  { %v860_v2 = vpop.permute.xlu1 %859 }
  0xc2   :  { %v862_v13 = vunpack.i.h.bf16 %v860_v2  ;;  %v861_v17 = vunpack.i.l.bf16 %v860_v2 }
 0x106   :  { %v1115_v4 = vpop.f32.mrb[0].mxu0 }
 0x107   :  { %v1117_v5 = vpop.f32.mrb[0].mxu1  ;;  %v350_v6 = vmul.f32 %v846_v61, %v1115_v4  ;;  %v1121_v9 = vpop.f32.mrb[1].mxu0 }
 0x108   :  { %v354_v8 = vmul.f32 %v857_v62, %v1117_v5  ;;  %v1123_v10 = vpop.f32.mrb[1].mxu1  ;;  %v349_v15 = vmul.f32 %v845_v63, %v1121_v9 }
 0x109   :  { %v353_v16 = vmul.f32 %v856_v0, %v1123_v10  ;;  %v365_v25 = vsel %vm357_vm10, %v350_v6, 0.0 }
 0x10a   :  { %v393_v26 = vsel %vm357_vm10, %v354_v8, 0.0  ;;  %v366_v27 = vrot.slane %v365_v25, 4  ;;  %v358_v31 = vsel %vm357_vm10, %v349_v15, 0.0  ;;  %v1131_v33 = vpop.f32.mrb[2].mxu0 }
 0x10b   :  { %v394_v30 = vrot.slane %v393_v26, 4  ;;  %v386_v32 = vsel %vm357_vm10, %v353_v16, 0.0  ;;  %v1133_v34 = vpop.f32.mrb[2].mxu1  ;;  %v359_v35 = vrot.slane %v358_v31, 4  ;;  %v352_v37 = vmul.f32 %v851_v20, %v1131_v33  ;;  %v1137_v39 = vpop.f32.mrb[3].mxu0 }
 0x10c   :  { %v387_v36 = vrot.slane %v386_v32, 4  ;;  %v356_v38 = vmul.f32 %v862_v13, %v1133_v34  ;;  %v1139_v40 = vpop.f32.mrb[3].mxu1  ;;  %v367_v41 = vadd.f32 %v366_v27, %v365_v25  ;;  %v351_v43 = vmul.f32 %v850_v22, %v1137_v39 }
 0x10d   :  { %v395_v42 = vadd.f32 %v394_v30, %v393_v26  ;;  %v355_v44 = vmul.f32 %v861_v17, %v1139_v40  ;;  %v360_v45 = vadd.f32 %v359_v35, %v358_v31  ;;  %v379_v47 = vsel %vm357_vm10, %v352_v37, 0.0 }
 0x10e   :  { %v388_v46 = vadd.f32 %v387_v36, %v386_v32  ;;  %v407_v48 = vsel %vm357_vm10, %v356_v38, 0.0  ;;  %v368_v49 = vrot.slane %v367_v41, 2  ;;  %v380_v51 = vrot.slane %v379_v47, 4 }
 0x10f   :  { %v396_v50 = vrot.slane %v395_v42, 2  ;;  %v408_v52 = vrot.slane %v407_v48, 4  ;;  %v361_v53 = vrot.slane %v360_v45, 2  ;;  %v372_v55 = vsel %vm357_vm10, %v351_v43, 0.0 }
 0x110   :  { %v389_v54 = vrot.slane %v388_v46, 2  ;;  %v400_v56 = vsel %vm357_vm10, %v355_v44, 0.0  ;;  %v381_v57 = vadd.f32 %v380_v51, %v379_v47  ;;  %v373_v59 = vrot.slane %v372_v55, 4  ;;  %v785_v47 = vld [vmem:[%s1244_s3] ss:$0 sm:$0xff] }
 0x111   :  { %v409_v58 = vadd.f32 %v408_v52, %v407_v48  ;;  %v401_v60 = vrot.slane %v400_v56, 4  ;;  %v369_v61 = vadd.f32 %v368_v49, %v367_v41  ;;  %v362_v62 = vadd.f32 %v361_v53, %v360_v45 }
 0x112   :  { %v397_v63 = vadd.f32 %v396_v50, %v395_v42  ;;  %v390_v0 = vadd.f32 %v389_v54, %v388_v46  ;;  %v382_v2 = vrot.slane %v381_v57, 2  ;;  %v374_v3 = vadd.f32 %v373_v59, %v372_v55 }
 0x113   :  { %v402_v6 = vadd.f32 %v401_v60, %v400_v56  ;;  %v370_v8 = vrot.slane %v369_v61, 1  ;;  %v363_v13 = vrot.slane %v362_v62, 1  ;;  %v410_v15 = vrot.slane %v409_v58, 2 }
 0x114   :  { %v375_v16 = vrot.slane %v374_v3, 2  ;;  %v398_v17 = vrot.slane %v397_v63, 1  ;;  %v391_v20 = vrot.slane %v390_v0, 1  ;;  %v383_v27 = vadd.f32 %v382_v2, %v381_v57 }
 0x115   :  { %v403_v22 = vrot.slane %v402_v6, 2  ;;  %v371_v25 = vadd.f32 %v370_v8, %v369_v61  ;;  %v364_v26 = vadd.f32 %v363_v13, %v362_v62  ;;  %v411_v32 = vadd.f32 %v410_v15, %v409_v58 }
 0x116   :  { %v376_v30 = vadd.f32 %v375_v16, %v374_v3  ;;  %v399_v31 = vadd.f32 %v398_v17, %v397_v63  ;;  %v392_v36 = vadd.f32 %v391_v20, %v390_v0  ;;  %v384_v37 = vrot.slane %v383_v27, 1 }
 0x117   :  { %424 = vrot.lane.b32.xlu1 %v371_v25, %s986_s1  ;;  %422 = vrot.lane.b32.xlu0 %v364_v26, %s986_s1  ;;  %v404_v35 = vadd.f32 %v403_v22, %v402_v6  ;;  %v412_v43 = vrot.slane %v411_v32, 1  ;;  %v786_v6 = vld [vmem:[%s1245_s4] ss:$0 sm:$0xff] }
 0x118   :  { %v377_v38 = vrot.slane %v376_v30, 1  ;;  %v385_v41 = vadd.f32 %v384_v37, %v383_v27 }
 0x119   :  { %v405_v44 = vrot.slane %v404_v35, 1  ;;  %v413_v45 = vadd.f32 %v412_v43, %v411_v32 }
 0x11a   :  { %v378_v42 = vadd.f32 %v377_v38, %v376_v30 }
 0x11b   :  { %432 = vrot.lane.b32.xlu1 %v399_v31, %s986_s1  ;;  %430 = vrot.lane.b32.xlu0 %v392_v36, %s986_s1  ;;  %v406_v46 = vadd.f32 %v405_v44, %v404_v35 }
 0x11f   :  { %428 = vrot.lane.b32.xlu1 %v385_v41, %s986_s1  ;;  %426 = vrot.lane.b32.xlu0 %v378_v42, %s986_s1 }
 0x123   :  { %436 = vrot.lane.b32.xlu1 %v413_v45, %s986_s1  ;;  %434 = vrot.lane.b32.xlu0 %v406_v46, %s986_s1  ;;  %v527_v45 = vand.u32 127, %v199_v1 }
 0x189   :  { %v425_v48 = vpop.permute.xlu1 %424  ;;  %v423_v49 = vpop.permute.xlu0 %422 }
 0x18a   :  { %v447_v50 = vadd.f32 %v1115_v4, %v425_v48  ;;  %v446_v51 = vadd.f32 %v423_v49, %v1121_v9  ;;  %v517_v48 = vstv %s1246_s5  ;;  %v542_v49 = vsub.s32 %v527_v45, %v1054_v7  ;;  %s987_s5 = smov [#allocation9]  }
 0x18b   :  { %s754_s8 = sshll.u32 %s987_s5, 4  ;;  %s755_s8 = int_to_ptr.vmem [resolvable:$true] %s754_s8 }
 0x18c   :  { %v462_v52 = vadd.f32 %v785_v47, %v447_v50  ;;  %v461_v53 = vadd.f32 %v785_v47, %v446_v51  ;;  %s927_s9 = scalar_lea.vmem %s755_s8, 128  ;;  %p932_p3 = scmp.lt.s32.totalorder %s755_s8, %s755_s8 }
 0x18d   :  { %v433_v54 = vpop.permute.xlu1 %432  ;;  %v431_v55 = vpop.permute.xlu0 %430  ;;  %p928_p2 = scmp.ne.s32.totalorder %s755_s8, %s927_s9  ;;  %p933_p4 = scmp.lt.s32.totalorder %s927_s9, %s927_s9 }
 0x18e   :  { %863 = vtanh.f32 %v462_v52  ;;  %v450_v56 = vadd.f32 %v431_v55, %v1123_v10  ;;  %v451_v60 = vadd.f32 %v1117_v5, %v433_v54 }
 0x18f   :  { %865 = vtanh.f32 %v461_v53  ;;  %p934_p5 = por %p933_p4, %p932_p3 }
 0x190   :  { %v465_v57 = vadd.f32 %v785_v47, %v450_v56  ;;  %v466_v2 = vadd.f32 %v785_v47, %v451_v60 }
 0x191   :  { %v429_v58 = vpop.permute.xlu1 %428  ;;  %v427_v59 = vpop.permute.xlu0 %426  ;;  %p935_p6 = pnand %p934_p5, %p928_p2 }
 0x192   :  { %v449_v61 = vadd.f32 %v1131_v33, %v429_v58  ;;  %v448_v62 = vadd.f32 %v427_v59, %v1137_v39  ;;  %867 = vtanh.f32 %v465_v57 }
 0x194   :  { %v464_v4 = vadd.f32 %v785_v47, %v449_v61  ;;  %v463_v9 = vadd.f32 %v785_v47, %v448_v62 }
 0x195   :  { %v437_v63 = vpop.permute.xlu1 %436  ;;  %v435_v0 = vpop.permute.xlu0 %434 }
 0x196   :  { %869 = vtanh.f32 %v464_v4  ;;  %v453_v3 = vadd.f32 %v1133_v34, %v437_v63  ;;  %v452_v10 = vadd.f32 %v435_v0, %v1139_v40 }
 0x197   :  { %871 = vtanh.f32 %v463_v9 }
 0x198   :  { %v864_v5 = vpop.eup %863  ;;  %v467_v33 = vadd.f32 %v785_v47, %v452_v10  ;;  %873 = vtanh.f32 %v466_v2  ;;  %v468_v13 = vadd.f32 %v785_v47, %v453_v3 }
 0x199   :  { %v866_v8 = vpop.eup %865  ;;  %v485_v39 = vmul.f32 %v864_v5, %v786_v6 }
 0x19a   :  { %v484_v15 = vmul.f32 %v866_v8, %v786_v6  ;;  %875 = vtanh.f32 %v467_v33 }
 0x19b   :  { %v495_v16 = vsel %vm69_vm0, %v485_v39, 0.0  ;;  %877 = vtanh.f32 %v468_v13 }
 0x19c   :  { %496 = vadd.xlane.f32.xlu1 %v495_v16  ;;  %v492_v34 = vsel %vm69_vm0, %v484_v15, 0.0  ;;  %v868_v17 = vpop.eup %867 }
 0x19d   :  { %493 = vadd.xlane.f32.xlu0 %v492_v34  ;;  %v488_v40 = vmul.f32 %v868_v17, %v786_v6 }
 0x19f   :  { %v504_v22 = vsel %vm69_vm0, %v488_v40, 0.0 }
 0x1a0   :  { %v870_v20 = vpop.eup %869  ;;  %505 = vadd.xlane.f32.xlu1 %v504_v22 }
 0x1a1   :  { %v872_v25 = vpop.eup %871  ;;  %v487_v26 = vmul.f32 %v870_v20, %v786_v6 }
 0x1a2   :  { %v486_v30 = vmul.f32 %v872_v25, %v786_v6  ;;  %v874_v31 = vpop.eup %873 }
 0x1a3   :  { %v501_v27 = vsel %vm69_vm0, %v487_v26, 0.0  ;;  %v489_v37 = vmul.f32 %v874_v31, %v786_v6 }
 0x1a4   :  { %502 = vadd.xlane.f32.xlu0 %v501_v27  ;;  %v876_v32 = vpop.eup %875  ;;  %v498_v36 = vsel %vm69_vm0, %v486_v30, 0.0  ;;  %v610_v30 = vsub.s32 1, %v1054_v7 }
 0x1a5   :  { %v490_v35 = vmul.f32 %v876_v32, %v786_v6  ;;  %v878_v38 = vpop.eup %877  ;;  %v507_v42 = vsel %vm69_vm0, %v489_v37, 0.0  ;;  %v617_v37 = vsub.s32 2, %v1054_v7 }
 0x1a6   :  { %v491_v43 = vmul.f32 %v878_v38, %v786_v6  ;;  %v638_v38 = vsub.s32 5, %v1054_v7 }
 0x1a7   :  { %v510_v41 = vsel %vm69_vm0, %v490_v35, 0.0 }
 0x1a8   :  { %499 = vadd.xlane.f32.xlu0 %v498_v36  ;;  %511 = vadd.xlane.f32.xlu1 %v510_v41  ;;  %v513_v44 = vsel %vm69_vm0, %v491_v43, 0.0  ;;  %v624_v43 = vsub.s32 3, %v1054_v7 }
 0x1ac   :  { %508 = vadd.xlane.f32.xlu0 %v507_v42 }
 0x1b0   :  { %514 = vadd.xlane.f32.xlu0 %v513_v44  ;;  %v652_v44 = vsub.s32 7, %v1054_v7 }
 0x1b9   :  { %529 = vperm.xlu1 %852, %v1067_v14  }
 0x229   :  { %v497_v46 = vpop.xlane.xlu1 %496 }
 0x22a   :  { %v494_v47 = vpop.xlane.xlu0 %493  ;;  %v519_v50 = vadd.f32 %v517_v48, %v497_v46 }
 0x22b   :  { %v518_v51 = vadd.f32 %v517_v48, %v494_v47  ;;  %v631_v47 = vsub.s32 4, %v1054_v7 }
 0x22c   :  { %v547_v54 = vrot.slane %v519_v50, %v542_v49 }
 0x22d   :  { %v506_v53 = vpop.xlane.xlu1 %505  ;;  %v543_v55 = vrot.slane %v518_v51, %v542_v49 }
 0x22e   :  { %v522_v14 = vadd.f32 %v517_v48, %v506_v53 }
 0x22f   :  { %v573_v60 = vsel %vm572_vm11, %v547_v54, %v543_v55 }
 0x230   :  { %v559_v4 = vrot.slane %v522_v14, %v542_v49 }
 0x231   :  { %v503_v52 = vpop.xlane.xlu0 %502 }
 0x232   :  { %v521_v56 = vadd.f32 %v517_v48, %v503_v52 }
 0x234   :  { %v555_v61 = vrot.slane %v521_v56, %v542_v49 }
 0x235   :  { %v500_v57 = vpop.xlane.xlu0 %499  ;;  %v512_v59 = vpop.xlane.xlu1 %511 }
 0x236   :  { %v520_v58 = vadd.f32 %v517_v48, %v500_v57  ;;  %v524_v2 = vadd.f32 %v517_v48, %v512_v59 }
 0x238   :  { %v551_v1 = vrot.slane %v520_v58, %v542_v49  ;;  %v567_v8 = vrot.slane %v524_v2, %v542_v49 }
 0x239   :  { %v509_v62 = vpop.xlane.xlu0 %508  ;;  %v530_v39 = vpop.permute.xlu1 %529 }
 0x23a   :  { %v575_v9 = vsel %vm574_vm12, %v551_v1, %v573_v60  ;;  %v523_v63 = vadd.f32 %v517_v48, %v509_v62  ;;  %vm531_vm4 = vcmp.lt.s32.totalorder %v527_v45, %v530_v39 }
 0x23b   :  { %v577_v0 = vsel %vm576_vm13, %v555_v61, %v575_v9 }
 0x23c   :  { %v563_v3 = vrot.slane %v523_v63, %v542_v49  ;;  %v579_v10 = vsel %vm578_vm14, %v559_v4, %v577_v0 }
 0x23d   :  { %v515_v6 = vpop.xlane.xlu0 %514 }
 0x23e   :  { %v525_v5 = vadd.f32 %v517_v48, %v515_v6  ;;  %v581_v33 = vsel %vm580_vm15, %v563_v3, %v579_v10  ;;  %v645_v48 = vsub.s32 6, %v1054_v7 }
 0x23f   :  { %v583_v15 = vsel %vm582_vm1, %v567_v8, %v581_v33 }
 0x240   :  { %v571_v13 = vrot.slane %v525_v5, %v542_v49 }
 0x242   :  { %v585_v16 = vsel %vm584_vm2, %v571_v13, %v583_v15 }
 0x243   :  { %v587_v34 = vsel %vm531_vm4, %v585_v16, -1e+09 }
 0x244   :  { %v589_v17 = vsel %vm588_vm3, %v587_v34, -inf }
 0x245   :  { %590 = vmax.xlane.f32.xlu0 %v589_v17 }
 0x2d2   :  { %v591_v40 = vpop.xlane.xlu0 %590 }
 0x2d3   :  { %v592_v20 = vsub.f32 %v587_v34, %v591_v40 }
 0x2d5   :  { %v593_v22 = vmul.f32 1.442695, %v592_v20 }
 0x2d7   :  { %879 = vpow2.f32 %v593_v22 }
 0x2e1   :  { %v880_v25 = vpop.eup %879 }
 0x2e2   :  { %v595_v26 = vsel %vm588_vm3, %v880_v25, 0.0 }
 0x2e3   :  { %596 = vadd.xlane.f32.xlu0 %v595_v26 }
 0x370   :  { %v597_v27 = vpop.xlane.xlu0 %596 }
 0x371   :  { %881 = vrcp.f32 %v597_v27 }
 0x37b   :  { %v882_v31 = vpop.eup %881 }
 0x37c   :  { %v599_v32 = vmul.f32 %v882_v31, %v880_v25 }
 0x37e   :  { %600 = vst.msk [vmem:[#allocation9] sm:$0xff] %vm588_vm3, %v599_v32  ;;  %v611_v35 = vrot.slane %v599_v32, %v610_v30  ;;  %v604_v36 = vrot.slane %v599_v32, %v1077_v21  ;;  %v618_v41 = vrot.slane %v599_v32, %v617_v37  ;;  %v639_v42 = vrot.slane %v599_v32, %v638_v38 }
 0x37f   :  { %v625_v45 = vrot.slane %v599_v32, %v624_v43  ;;  %v653_v46 = vrot.slane %v599_v32, %v652_v44  ;;  %v632_v21 = vrot.slane %v599_v32, %v631_v47  ;;  %v646_v49 = vrot.slane %v599_v32, %v645_v48 }
 0x380   :  { %613 = vbcast.lane.b32.xlu1 %v611_v35, 256  ;;  %606 = vbcast.lane.b32.xlu0 %v604_v36, 256 }
 0x384   :  { %620 = vbcast.lane.b32.xlu1 %v618_v41, 256  ;;  %641 = vbcast.lane.b32.xlu0 %v639_v42, 256 }
 0x388   :  { %627 = vbcast.lane.b32.xlu1 %v625_v45, 256  ;;  %655 = vbcast.lane.b32.xlu0 %v653_v46, 256 }
 0x38c   :  { %634 = vbcast.lane.b32.xlu1 %v632_v21, 256 }
 0x390   :  { %648 = vbcast.lane.b32.xlu1 %v646_v49, 256 }
 0x391   :  { %938 = shalt.err (!%p935_p6)
}
 0x392   :  { %s939_s12 = scalar_lea.hbm %s1248_s7, 128 }
 0x393   :  { %p940_p7 = scmp.ne.s32.totalorder %s1248_s7, %s939_s12  ;;  %p943_p8 = scmp.lt.u32.totalorder %s939_s12, %s1248_s7 }
 0x395   :  { %p945_p9 = pnand %p943_p8, %p940_p7 }
 0x397   :  { %948 = shalt.err (!%p945_p9)
}
 0x398   :  { %757 = dma.vmem_to_hbm [thread:$0]  %s755_s8, 128, %s1248_s7, [#allocation10]  }
 0x399   :  { %s988_s7 = smov [#allocation8]  }
 0x39a   :  { %s744_s19 = sshll.u32 %s988_s7, 4  ;;  %s745_s19 = int_to_ptr.vmem [resolvable:$true] %s744_s19 }
 0x39b   :  { %s949_s20 = scalar_lea.vmem %s745_s19, 128  ;;  %p954_p11 = scmp.lt.s32.totalorder %s745_s19, %s745_s19 }
 0x39c   :  { %p950_p10 = scmp.ne.s32.totalorder %s745_s19, %s949_s20  ;;  %p955_p12 = scmp.lt.s32.totalorder %s949_s20, %s949_s20 }
 0x39e   :  { %p956_p13 = por %p955_p12, %p954_p11 }
 0x3a0   :  { %p957_p0 = pnand %p956_p13, %p950_p10 }
 0x3f2   :  { %v614_v7 = vpop.permute.xlu1 %613  ;;  %v607_v50 = vpop.permute.xlu0 %606 }
 0x3f3   :  { %v658_v51 = vmul.f32 %v614_v7, %v1072_v18  ;;  %v657_v52 = vmul.f32 %v607_v50, %v1056_v11 }
 0x3f5   :  { %v672_v53 = vsel %vm69_vm0, %v658_v51, 0.0  ;;  %v665_v54 = vsel %vm69_vm0, %v657_v52, 0.0 }
 0x3f6   :  { %v673_v55 = vrot.slane %v672_v53, 4  ;;  %v666_v56 = vrot.slane %v665_v54, 4  ;;  %v621_v57 = vpop.permute.xlu1 %620  ;;  %v642_v14 = vpop.permute.xlu0 %641 }
 0x3f7   :  { %v659_v58 = vmul.f32 %v621_v57, %v1079_v23  ;;  %v662_v1 = vmul.f32 %v642_v14, %v1074_v19 }
 0x3f8   :  { %v674_v59 = vadd.f32 %v673_v55, %v672_v53  ;;  %v667_v60 = vadd.f32 %v666_v56, %v665_v54 }
 0x3f9   :  { %v679_v61 = vsel %vm69_vm0, %v659_v58, 0.0  ;;  %v700_v18 = vsel %vm69_vm0, %v662_v1, 0.0 }
 0x3fa   :  { %v675_v62 = vrot.slane %v674_v59, 2  ;;  %v668_v11 = vrot.slane %v667_v60, 2  ;;  %v680_v4 = vrot.slane %v679_v61, 4  ;;  %v628_v9 = vpop.permute.xlu1 %627  ;;  %v656_v63 = vpop.permute.xlu0 %655  ;;  %v701_v0 = vrot.slane %v700_v18, 4 }
 0x3fb   :  { %v660_v2 = vmul.f32 %v628_v9, %v1091_v28  ;;  %v664_v3 = vmul.f32 %v656_v63, %v1093_v29 }
 0x3fc   :  { %v681_v10 = vadd.f32 %v680_v4, %v679_v61  ;;  %v676_v6 = vadd.f32 %v675_v62, %v674_v59  ;;  %v669_v5 = vadd.f32 %v668_v11, %v667_v60  ;;  %v702_v39 = vadd.f32 %v701_v0, %v700_v18 }
 0x3fd   :  { %v686_v23 = vsel %vm69_vm0, %v660_v2, 0.0  ;;  %v714_v19 = vsel %vm69_vm0, %v664_v3, 0.0 }
 0x3fe   :  { %v682_v33 = vrot.slane %v681_v10, 2  ;;  %v635_v8 = vpop.permute.xlu1 %634  ;;  %v687_v13 = vrot.slane %v686_v23, 4  ;;  %v715_v15 = vrot.slane %v714_v19, 4  ;;  %v677_v29 = vrot.slane %v676_v6, 1 }
 0x3ff   :  { %v661_v16 = vmul.f32 %v635_v8, %v1058_v12  ;;  %v670_v25 = vrot.slane %v669_v5, 1  ;;  %v703_v26 = vrot.slane %v702_v39, 2 }
 0x400   :  { %v683_v34 = vadd.f32 %v682_v33, %v681_v10  ;;  %v688_v17 = vadd.f32 %v687_v13, %v686_v23  ;;  %v716_v40 = vadd.f32 %v715_v15, %v714_v19  ;;  %v678_v41 = vadd.f32 %v677_v29, %v676_v6 }
 0x401   :  { %v693_v28 = vsel %vm69_vm0, %v661_v16, 0.0  ;;  %v671_v42 = vadd.f32 %v670_v25, %v669_v5  ;;  %v704_v43 = vadd.f32 %v703_v26, %v702_v39 }
 0x402   :  { %v694_v20 = vrot.slane %v693_v28, 4  ;;  %v649_v22 = vpop.permute.xlu1 %648  ;;  %v689_v27 = vrot.slane %v688_v17, 2  ;;  %v684_v31 = vrot.slane %v683_v34, 1  ;;  %v717_v36 = vrot.slane %v716_v40, 2 }
 0x403   :  { %v663_v30 = vmul.f32 %v649_v22, %v1081_v24  ;;  %v729_v24 = vsel %vm572_vm11, %v678_v41, %v671_v42  ;;  %v705_v50 = vrot.slane %v704_v43, 1 }
 0x404   :  { %v695_v32 = vadd.f32 %v694_v20, %v693_v28  ;;  %v690_v35 = vadd.f32 %v689_v27, %v688_v17  ;;  %v685_v45 = vadd.f32 %v684_v31, %v683_v34  ;;  %v718_v48 = vadd.f32 %v717_v36, %v716_v40 }
 0x405   :  { %v707_v37 = vsel %vm69_vm0, %v663_v30, 0.0  ;;  %v706_v14 = vadd.f32 %v705_v50, %v704_v43 }
 0x406   :  { %v696_v12 = vrot.slane %v695_v32, 2  ;;  %v708_v38 = vrot.slane %v707_v37, 4  ;;  %v691_v44 = vrot.slane %v690_v35, 1  ;;  %v730_v51 = vsel %vm574_vm12, %v685_v45, %v729_v24 }
 0x407   :  { %v719_v55 = vrot.slane %v718_v48, 1 }
 0x408   :  { %v697_v46 = vadd.f32 %v696_v12, %v695_v32  ;;  %v709_v47 = vadd.f32 %v708_v38, %v707_v37  ;;  %v692_v21 = vadd.f32 %v691_v44, %v690_v35 }
 0x409   :  { %v720_v1 = vadd.f32 %v719_v55, %v718_v48 }
 0x40a   :  { %v698_v49 = vrot.slane %v697_v46, 1  ;;  %v710_v7 = vrot.slane %v709_v47, 2  ;;  %v731_v54 = vsel %vm576_vm13, %v692_v21, %v730_v51 }
 0x40c   :  { %v699_v52 = vadd.f32 %v698_v49, %v697_v46  ;;  %v711_v53 = vadd.f32 %v710_v7, %v709_v47 }
 0x40e   :  { %v712_v56 = vrot.slane %v711_v53, 1  ;;  %v732_v57 = vsel %vm578_vm14, %v699_v52, %v731_v54 }
 0x40f   :  { %v733_v59 = vsel %vm580_vm15, %v706_v14, %v732_v57 }
 0x410   :  { %v713_v58 = vadd.f32 %v712_v56, %v711_v53 }
 0x412   :  { %v734_v60 = vsel %vm582_vm1, %v713_v58, %v733_v59 }
 0x413   :  { %v735_v61 = vsel %vm584_vm2, %v720_v1, %v734_v60 }
 0x414   :  { %737 = vst.msk [vmem:[#allocation8] sm:$0xff] %vm69_vm0, %v735_v61 }
 0x415   :  { %960 = shalt.err (!%p957_p0)
}
 0x416   :  { %s961_s23 = scalar_lea.hbm %s1247_s6, 128 }
 0x417   :  { %p962_p1 = scmp.ne.s32.totalorder %s1247_s6, %s961_s23  ;;  %p965_p2 = scmp.lt.u32.totalorder %s961_s23, %s1247_s6 }
 0x419   :  { %p967_p3 = pnand %p965_p2, %p962_p1 }
 0x41b   :  { %970 = shalt.err (!%p967_p3)
}
 0x41c   :  { %747 = dma.vmem_to_hbm [thread:$0]  %s745_s19, 128, %s1247_s6, [#allocation5]  }
 0x41d   :  { %975 = dma.done.wait [#allocation5], 128  }
 0x41e   :  { %976 = vsyncadd [#allocation5], 4294967168 }
 0x41f   :  { %977 = dma.done.wait [#allocation10], 128  }
 0x420   :  { %978 = vsyncadd [#allocation10], 4294967168 }
 0x421   :  { %764 = vsyncpa [#allocation4], 1 }
 0x422   :  { %765 = vsyncpa [#allocation7], 1 }
 0x423   :  { %766 = vsyncpa [#allocation5], 1 }
 0x424   :  { %767 = vsyncpa [#allocation10], 1 }

</bundles_post_ra>
